<compile_context>
chip_gen: v6e
topology: v6e:2x2x1
jax: 0.10.0
libtpu: 0.0.40
codegen_flags: <defaults>
</compile_context>

<pallas_src>
import jax
import jax.numpy as jnp
import numpy as np
from jax.experimental import pallas as pl
from jax.experimental.pallas import tpu as pltpu

SELU_ALPHA = 1.6732632423543772
SELU_SCALE = 1.0507009873554805

C_OUT = 13              # conv3d out channels
S = 16 * 7 * 7          # 784 spatial elements per channel
F1, F2, F3 = 121, 52, 10

F1_PAD = 128
F2_PAD = 128
F3_PAD = 128            # lane-dense output slab; real logits live in cols [0,10)


def _selu(x):
    return SELU_SCALE * jnp.where(x > 0, x, SELU_ALPHA * (jnp.exp(x) - 1.0))


def _round_up(n, m):
    return ((n + m - 1) // m) * m


# ----------------------------------------------------------------------------
# Kernel body: one batch tile end-to-end (matmul -> SELU -> matmul -> SELU ->
# matmul -> masked log-softmax).  Weights are VMEM-resident across the grid.
# ----------------------------------------------------------------------------
def _kernel(x_ref, w1_ref, b1_ref, w2_ref, w3_ref, out_ref):
    # x tile: (TB, 784) f32 streamed from HBM; cast to bf16 only for the MXU.
    x = x_ref[...].astype(jnp.bfloat16)

    h = jnp.dot(x, w1_ref[...], preferred_element_type=jnp.float32)     # (TB,128)
    h = _selu(h + b1_ref[...])                                          # f32

    h = jnp.dot(h.astype(jnp.bfloat16), w2_ref[...],
                preferred_element_type=jnp.float32)                     # (TB,128)
    h = _selu(h)

    logits = jnp.dot(h.astype(jnp.bfloat16), w3_ref[...],
                     preferred_element_type=jnp.float32)                # (TB,128)

    # Masked LogSoftmax over the first F3=10 (real) lanes, f32 throughout.
    lane = jax.lax.broadcasted_iota(jnp.int32, logits.shape, 1)
    mask = lane < F3
    masked = jnp.where(mask, logits, -1e30)
    m = jnp.max(masked, axis=-1, keepdims=True)
    z = masked - m                                # padded lanes stay very negative
    e = jnp.exp(z)                                # -> exactly 0 on padded lanes
    lse = jnp.log(jnp.sum(e, axis=-1, keepdims=True))
    out_ref[...] = jnp.where(mask, z - lse, 0.0).astype(out_ref.dtype)


# ----------------------------------------------------------------------------
# One-time weight preparation (hoisted out of the per-call path).
# Folds the 1x1x1 Conv3d (1->13 ch) into Linear1:
#   Weff[s,f] = sum_c wconv[c] * W1[f, c*784+s]      (784 x 121)
#   b1[f]     = sum_c bconv[c] * sum_s W1[f, c*784+s]
# and pads / transposes / bf16-casts all matmul operands.
# ----------------------------------------------------------------------------
def fold_and_pad_params(wconv, bconv, w1, w2, w3):
    w1r = jnp.transpose(w1).reshape(C_OUT, S, F1)          # (13, 784, 121)
    weff = jnp.einsum('c,csf->sf', wconv, w1r)             # (784, 121) f32
    b1 = bconv @ w1r.sum(axis=1)                           # (121,)

    weff_p = (jnp.zeros((S, F1_PAD), jnp.float32)
              .at[:, :F1].set(weff)).astype(jnp.bfloat16)           # (784, 128)
    b1_p = jnp.zeros((1, F1_PAD), jnp.float32).at[0, :F1].set(b1)   # (1, 128)
    w2p = (jnp.zeros((F1_PAD, F2_PAD), jnp.float32)
           .at[:F1, :F2].set(jnp.transpose(w2))).astype(jnp.bfloat16)
    w3p = (jnp.zeros((F2_PAD, F3_PAD), jnp.float32)
           .at[:F2, :F3].set(jnp.transpose(w3))).astype(jnp.bfloat16)
    return weff_p, b1_p, w2p, w3p


# ----------------------------------------------------------------------------
# Kernel wrapper: takes pre-folded weights.  x: anything reshapeable to
# (B, 784).  Returns (B, 10) f32 log-probs.
# ----------------------------------------------------------------------------
def conv3d_then_linear_folded(x, weff_p, b1_p, w2p, w3p, tb=2048):
    B = x.shape[0]
    x_flat = x.reshape(B, S).astype(jnp.float32)

    # Batch tile: >=2 grid steps at large B (v7x megacore), rows rounded to 16.
    TB = min(tb, _round_up(pl.cdiv(B, 2), 16))
    TB = max(TB, 16)
    nb = pl.cdiv(B, TB)
    B_pad = nb * TB
    if B_pad == B:
        x_p = x_flat
    else:
        x_p = jnp.zeros((B_pad, S), jnp.float32).at[:B].set(x_flat)

    out = pl.pallas_call(
        _kernel,
        out_shape=jax.ShapeDtypeStruct((B_pad, F3_PAD), jnp.bfloat16),
        grid=(nb,),
        in_specs=[
            # x tile: full (unpadded) last dim is legal under the (8,128) rule.
            pl.BlockSpec((TB, S), lambda i: (i, 0)),           # streamed
            pl.BlockSpec((S, F1_PAD), lambda i: (0, 0)),       # folded Weff (resident)
            pl.BlockSpec((1, F1_PAD), lambda i: (0, 0)),       # folded bias
            pl.BlockSpec((F1_PAD, F2_PAD), lambda i: (0, 0)),  # W2^T
            pl.BlockSpec((F2_PAD, F3_PAD), lambda i: (0, 0)),  # W3^T
        ],
        out_specs=pl.BlockSpec((TB, F3_PAD), lambda i: (i, 0)),
        compiler_params=pltpu.CompilerParams(
            dimension_semantics=("parallel",),
            vmem_limit_bytes=48 * 1024 * 1024,
        ),
    )(x_p, weff_p, b1_p, w2p, w3p)

    # Consumers that can take the padded bf16 slab should use `out` directly;
    # this slice+cast is only for an exact (B, 10) f32 interface.
    return out[:B, :F3].astype(jnp.float32)


def conv3d_then_linear(x, wconv, bconv, w1, w2, w3, tb=2048):
    """Convenience wrapper with raw PyTorch-layout params (folds every call)."""
    return conv3d_then_linear_folded(x, *fold_and_pad_params(wconv, bconv, w1, w2, w3),
                                     tb=tb)


# ----------------------------------------------------------------------------
# Parameter init + pure-f32 reference matching the PyTorch module.
# ----------------------------------------------------------------------------
def init_params(key):
    k = jax.random.split(key, 5)
    wconv = jax.random.normal(k[0], (C_OUT,), jnp.float32) * 0.5
    bconv = jax.random.normal(k[1], (C_OUT,), jnp.float32) * 0.1
    w1 = jax.random.normal(k[2], (F1, C_OUT * S), jnp.float32) / np.sqrt(C_OUT * S)
    w2 = jax.random.normal(k[3], (F2, F1), jnp.float32) / np.sqrt(F1)
    w3 = jax.random.normal(k[4], (F3, F2), jnp.float32) / np.sqrt(F2)
    return wconv, bconv, w1, w2, w3


def reference(x, wconv, bconv, w1, w2, w3):
    B = x.shape[0]
    xr = x.reshape(B, 1, 16, 7, 7).astype(jnp.float32)
    conv = (xr[:, 0:1] * wconv.reshape(1, C_OUT, 1, 1, 1)
            + bconv.reshape(1, C_OUT, 1, 1, 1))               # (B,13,16,7,7)
    h = conv.reshape(B, C_OUT * S)
    h = _selu(h @ w1.T)
    h = _selu(h @ w2.T)
    logits = h @ w3.T
    return jax.nn.log_softmax(logits, axis=1)


if __name__ == "__main__":
    key = jax.random.PRNGKey(0)
    kx, kp = jax.random.split(key)
    # module expects anything reshapeable to (B, 1, 16, 7, 7) => 784 elems/row
    x = jax.random.normal(kx, (2, 1, 28, 28), jnp.float32)

    wconv, bconv, w1, w2, w3 = init_params(kp)

    # Fold/pad weights once (hoisted out of the per-call path), then run.
    folded = fold_and_pad_params(wconv, bconv, w1, w2, w3)
    folded = jax.block_until_ready(folded)

    out = conv3d_then_linear_folded(x, *folded)
    out = jax.block_until_ready(out)

    ref = reference(x, wconv, bconv, w1, w2, w3)
    # bf16 matmul operands + conv-fold reassociation + bf16 output slab
    np.testing.assert_allclose(np.asarray(out), np.asarray(ref),
                               rtol=2e-2, atol=5e-2)
    print("KERNEL_OK")
</pallas_src>

<mosaic_0001>
module attributes {stable_mosaic.version = 11 : i64} {
  func.func @_kernel(%arg0: i32, %arg1: memref<16x784xf32, #tpu.memory_space<vmem>>, %arg2: memref<784x128xbf16, #tpu.memory_space<vmem>>, %arg3: memref<1x128xf32, #tpu.memory_space<vmem>>, %arg4: memref<128x128xbf16, #tpu.memory_space<vmem>>, %arg5: memref<128x128xbf16, #tpu.memory_space<vmem>>, %arg6: memref<16x128xbf16, #tpu.memory_space<vmem>>) attributes {dimension_semantics = [#tpu.dimension_semantics<parallel>], iteration_bounds = array<i64: 1>, scalar_prefetch = 0 : i64, scratch_operands = 0 : i64, tpu.core_type = #tpu.core_type<tc>, window_params = [{transform_indices = @transform_0, window_bounds = array<i64: 16, 784>}, {pipeline_mode = #tpu.pipeline_mode<synchronous>, transform_indices = @transform_1, window_bounds = array<i64: 784, 128>}, {pipeline_mode = #tpu.pipeline_mode<synchronous>, transform_indices = @transform_2, window_bounds = array<i64: 1, 128>}, {pipeline_mode = #tpu.pipeline_mode<synchronous>, transform_indices = @transform_3, window_bounds = array<i64: 128, 128>}, {pipeline_mode = #tpu.pipeline_mode<synchronous>, transform_indices = @transform_4, window_bounds = array<i64: 128, 128>}, {transform_indices = @transform_5, window_bounds = array<i64: 16, 128>}]} {
    %c0 = arith.constant 0 : index
    %c0_0 = arith.constant 0 : index
    %0 = vector.load %arg1[%c0, %c0_0] : memref<16x784xf32, #tpu.memory_space<vmem>>, vector<16x784xf32>
    %1 = arith.truncf %0 : vector<16x784xf32> to vector<16x784xbf16>
    %c0_1 = arith.constant 0 : index
    %c0_2 = arith.constant 0 : index
    %2 = vector.load %arg2[%c0_1, %c0_2] : memref<784x128xbf16, #tpu.memory_space<vmem>>, vector<784x128xbf16>
    %cst = arith.constant dense<0.000000e+00> : vector<16x128xf32>
    %3 = tpu.matmul %1, %2, %cst {dimension_numbers = #tpu.dot_dimension_numbers<[1], [0], [0], [1], [0, 0, 1, 1], [], []>} : vector<16x784xbf16>, vector<784x128xbf16>, vector<16x128xf32> -> vector<16x128xf32>
    %c0_3 = arith.constant 0 : index
    %c0_4 = arith.constant 0 : index
    %4 = vector.load %arg3[%c0_3, %c0_4] : memref<1x128xf32, #tpu.memory_space<vmem>>, vector<1x128xf32>
    %5 = vector.broadcast %4 : vector<1x128xf32> to vector<16x128xf32>
    %6 = arith.addf %3, %5 : vector<16x128xf32>
    %cst_5 = arith.constant 0.000000e+00 : f32
    %7 = vector.broadcast %cst_5 : f32 to vector<16x128xf32>
    %8 = arith.cmpf ogt, %6, %7 : vector<16x128xf32>
    %9 = math.exp %6 : vector<16x128xf32>
    %cst_6 = arith.constant 1.000000e+00 : f32
    %10 = vector.broadcast %cst_6 : f32 to vector<16x128xf32>
    %11 = arith.subf %9, %10 : vector<16x128xf32>
    %cst_7 = arith.constant 1.67326319 : f32
    %12 = vector.broadcast %cst_7 : f32 to vector<16x128xf32>
    %13 = arith.mulf %12, %11 : vector<16x128xf32>
    %14 = arith.select %8, %6, %13 : vector<16x128xi1>, vector<16x128xf32>
    %cst_8 = arith.constant 1.05070102 : f32
    %15 = vector.broadcast %cst_8 : f32 to vector<16x128xf32>
    %16 = arith.mulf %15, %14 : vector<16x128xf32>
    %17 = arith.truncf %16 : vector<16x128xf32> to vector<16x128xbf16>
    %c0_9 = arith.constant 0 : index
    %c0_10 = arith.constant 0 : index
    %18 = vector.load %arg4[%c0_9, %c0_10] : memref<128x128xbf16, #tpu.memory_space<vmem>>, vector<128x128xbf16>
    %cst_11 = arith.constant dense<0.000000e+00> : vector<16x128xf32>
    %19 = tpu.matmul %17, %18, %cst_11 {dimension_numbers = #tpu.dot_dimension_numbers<[1], [0], [0], [1], [0, 0, 1, 1], [], []>} : vector<16x128xbf16>, vector<128x128xbf16>, vector<16x128xf32> -> vector<16x128xf32>
    %cst_12 = arith.constant 0.000000e+00 : f32
    %20 = vector.broadcast %cst_12 : f32 to vector<16x128xf32>
    %21 = arith.cmpf ogt, %19, %20 : vector<16x128xf32>
    %22 = math.exp %19 : vector<16x128xf32>
    %cst_13 = arith.constant 1.000000e+00 : f32
    %23 = vector.broadcast %cst_13 : f32 to vector<16x128xf32>
    %24 = arith.subf %22, %23 : vector<16x128xf32>
    %cst_14 = arith.constant 1.67326319 : f32
    %25 = vector.broadcast %cst_14 : f32 to vector<16x128xf32>
    %26 = arith.mulf %25, %24 : vector<16x128xf32>
    %27 = arith.select %21, %19, %26 : vector<16x128xi1>, vector<16x128xf32>
    %cst_15 = arith.constant 1.05070102 : f32
    %28 = vector.broadcast %cst_15 : f32 to vector<16x128xf32>
    %29 = arith.mulf %28, %27 : vector<16x128xf32>
    %30 = arith.truncf %29 : vector<16x128xf32> to vector<16x128xbf16>
    %c0_16 = arith.constant 0 : index
    %c0_17 = arith.constant 0 : index
    %31 = vector.load %arg5[%c0_16, %c0_17] : memref<128x128xbf16, #tpu.memory_space<vmem>>, vector<128x128xbf16>
    %cst_18 = arith.constant dense<0.000000e+00> : vector<16x128xf32>
    %32 = tpu.matmul %30, %31, %cst_18 {dimension_numbers = #tpu.dot_dimension_numbers<[1], [0], [0], [1], [0, 0, 1, 1], [], []>} : vector<16x128xbf16>, vector<128x128xbf16>, vector<16x128xf32> -> vector<16x128xf32>
    %33 = tpu.iota {dimensions = array<i32: 1>} : vector<16x128xi32>
    %c10_i32 = arith.constant 10 : i32
    %34 = vector.broadcast %c10_i32 : i32 to vector<16x128xi32>
    %35 = arith.cmpi slt, %33, %34 : vector<16x128xi32>
    %cst_19 = arith.constant -1.000000e+30 : f32
    %36 = vector.broadcast %cst_19 : f32 to vector<16x128xf32>
    %37 = arith.select %35, %32, %36 : vector<16x128xi1>, vector<16x128xf32>
    %cst_20 = arith.constant dense<0xFF800000> : vector<16xf32>
    %38 = vector.multi_reduction <maximumf>, %37, %cst_20 [1] : vector<16x128xf32> to vector<16xf32>
    %39 = vector.shape_cast %38 : vector<16xf32> to vector<16x1xf32>
    %40 = vector.broadcast %39 : vector<16x1xf32> to vector<16x128xf32>
    %41 = arith.subf %37, %40 : vector<16x128xf32>
    %42 = math.exp %41 : vector<16x128xf32>
    %cst_21 = arith.constant dense<0.000000e+00> : vector<16xf32>
    %43 = vector.multi_reduction <add>, %42, %cst_21 [1] : vector<16x128xf32> to vector<16xf32>
    %44 = vector.shape_cast %43 : vector<16xf32> to vector<16x1xf32>
    %45 = math.log %44 : vector<16x1xf32>
    %46 = vector.broadcast %45 : vector<16x1xf32> to vector<16x128xf32>
    %47 = arith.subf %41, %46 : vector<16x128xf32>
    %cst_22 = arith.constant 0.000000e+00 : f32
    %48 = vector.broadcast %cst_22 : f32 to vector<16x128xf32>
    %49 = arith.select %35, %47, %48 : vector<16x128xi1>, vector<16x128xf32>
    %50 = arith.truncf %49 : vector<16x128xf32> to vector<16x128xbf16>
    %c0_23 = arith.constant 0 : index
    %c0_24 = arith.constant 0 : index
    %51 = vector.load %arg6[%c0_23, %c0_24] : memref<16x128xbf16, #tpu.memory_space<vmem>>, vector<16x128xbf16>
    tpu.vector_store %arg6[%c0_23, %c0_24], %50 {strides = array<i32>} : memref<16x128xbf16, #tpu.memory_space<vmem>>, vector<16x128xbf16>,
    return
  }
  func.func @transform_0(%arg0: i32) -> (i32, i32) {
    %c0_i32 = arith.constant 0 : i32
    %c0_i32_0 = arith.constant 0 : i32
    return %arg0, %c0_i32 : i32, i32
  }
  func.func @transform_1(%arg0: i32) -> (i32, i32) {
    %c0_i32 = arith.constant 0 : i32
    %c0_i32_0 = arith.constant 0 : i32
    %c0_i32_1 = arith.constant 0 : i32
    return %c0_i32, %c0_i32_0 : i32, i32
  }
  func.func @transform_2(%arg0: i32) -> (i32, i32) {
    %c0_i32 = arith.constant 0 : i32
    %c0_i32_0 = arith.constant 0 : i32
    %c0_i32_1 = arith.constant 0 : i32
    return %c0_i32, %c0_i32_0 : i32, i32
  }
  func.func @transform_3(%arg0: i32) -> (i32, i32) {
    %c0_i32 = arith.constant 0 : i32
    %c0_i32_0 = arith.constant 0 : i32
    %c0_i32_1 = arith.constant 0 : i32
    return %c0_i32, %c0_i32_0 : i32, i32
  }
  func.func @transform_4(%arg0: i32) -> (i32, i32) {
    %c0_i32 = arith.constant 0 : i32
    %c0_i32_0 = arith.constant 0 : i32
    %c0_i32_1 = arith.constant 0 : i32
    return %c0_i32, %c0_i32_0 : i32, i32
  }
  func.func @transform_5(%arg0: i32) -> (i32, i32) {
    %c0_i32 = arith.constant 0 : i32
    %c0_i32_0 = arith.constant 0 : i32
    return %arg0, %c0_i32 : i32, i32
  }
}

</mosaic_0001>

<bundles_post_ra>
// kernel: tpu_custom_call.1
= control target key start
LH: loop header
LB: loop body
LE: loop exit
PB: predicated region body
PF: predicated region fallthrough
CT: control target
= control target key end

     0   :  { %10 = vsyncpa [#allocation3], 0  ;;  %s1471_s0 = inlined_call_operand.hbm [shape: f32[16,784], index: 0, kind: input, shape index: {}]   ;;  %s1472_s1 = inlined_call_operand.hbm [shape: bf16[784,128], index: 1, kind: input, shape index: {}]   ;;  %s1473_s2 = inlined_call_operand.vmem [shape: f32[1,128], index: 2, kind: input, shape index: {}]   ;;  %s1474_s3 = inlined_call_operand.hbm [shape: bf16[128,128], index: 3, kind: input, shape index: {}]   ;;  %s1475_s4 = inlined_call_operand.hbm [shape: bf16[128,128], index: 4, kind: input, shape index: {}]   ;;  %s1476_s5 = inlined_call_operand.hbm [shape: bf16[16,128], index: 5, kind: output, shape index: {}]  }
   0x1   :  { %11 = vsyncpa [#allocation6], 0 }
   0x2   :  { %12 = vsyncpa [#allocation9], 0 }
   0x3   :  { %13 = vsyncpa [#allocation4], 0  ;;  %s1373_s18 = smov [#allocation5]  }
   0x4   :  { %s31_s19 = sshll.u32 %s1373_s18, 4  ;;  %s32_s19 = int_to_ptr.vmem [resolvable:$true] %s31_s19 }
   0x5   :  { %s1273_s20 = scalar_lea.vmem %s32_s19, 6272  ;;  %p1278_p1 = scmp.lt.s32.totalorder %s32_s19, %s32_s19 }
   0x6   :  { %p1274_p0 = scmp.ne.s32.totalorder %s32_s19, %s1273_s20  ;;  %p1279_p2 = scmp.lt.s32.totalorder %s1273_s20, %s1273_s20 }
   0x8   :  { %p1280_p3 = por %p1279_p2, %p1278_p1 }
   0xa   :  { %p1281_p4 = pnand %p1280_p3, %p1274_p0 }
   0xc   :  { %1284 = shalt.err (!%p1281_p4)
}
   0xd   :  { %s1374_s21 = smov 64   ;;  %s1375_s22 = smov 4  }
   0xe   :  { %37 = dma.hbm_to_vmem [thread:$0]  %s1472_s1, 6272, %s32_s19, [#allocation6], %s1374_s21, %s1374_s21, %s1375_s22  }
   0xf   :  { %s1376_s25 = smov [#allocation2]  }
  0x10   :  { %s19_s26 = sshll.u32 %s1376_s25, 4  ;;  %s20_s26 = int_to_ptr.vmem [resolvable:$true] %s19_s26 }
  0x11   :  { %s1293_s27 = scalar_lea.vmem %s20_s26, 1792  ;;  %p1298_p6 = scmp.lt.s32.totalorder %s20_s26, %s20_s26 }
  0x12   :  { %p1294_p5 = scmp.ne.s32.totalorder %s20_s26, %s1293_s27  ;;  %p1299_p7 = scmp.lt.s32.totalorder %s1293_s27, %s1293_s27 }
  0x14   :  { %p1300_p8 = por %p1299_p7, %p1298_p6 }
  0x16   :  { %p1301_p9 = pnand %p1300_p8, %p1294_p5 }
  0x18   :  { %1304 = shalt.err (!%p1301_p9)
}
  0x19   :  { %s1377_s28 = smov 896   ;;  %s1378_s29 = smov 56  }
  0x1a   :  { %25 = dma.hbm_to_vmem [thread:$0]  %s1471_s0, 1792, %s20_s26, [#allocation3], %s1377_s28, %s1377_s28, %s1378_s29  }
  0x1b   :  { %s1379_s7 = smov [#allocation7]   ;;  %s1380_s9 = smov [#allocation8]  }
  0x1c   :  { %s45_s8 = sshll.u32 %s1379_s7, 4  ;;  %s57_s1 = sshll.u32 %s1380_s9, 4  ;;  %s46_s8 = int_to_ptr.vmem [resolvable:$true] %s45_s8  ;;  %s58_s1 = int_to_ptr.vmem [resolvable:$true] %s57_s1 }
  0x1d   :  { %s1313_s10 = scalar_lea.vmem %s46_s8, 1024  ;;  %p1318_p11 = scmp.lt.s32.totalorder %s46_s8, %s46_s8 }
  0x1e   :  { %p1314_p10 = scmp.ne.s32.totalorder %s46_s8, %s1313_s10  ;;  %p1319_p12 = scmp.lt.s32.totalorder %s1313_s10, %s1313_s10 }
  0x20   :  { %p1320_p13 = por %p1319_p12, %p1318_p11 }
  0x22   :  { %p1321_p0 = pnand %p1320_p13, %p1314_p10 }
  0x24   :  { %1324 = shalt.err (!%p1321_p0)
}
  0x25   :  { %51 = dma.hbm_to_vmem [thread:$0]  %s1474_s3, 1024, %s46_s8, [#allocation6], %s1374_s21, %s1374_s21, %s1375_s22  }
  0x26   :  { %s1333_s0 = scalar_lea.vmem %s58_s1, 1024  ;;  %p1338_p2 = scmp.lt.s32.totalorder %s58_s1, %s58_s1 }
  0x27   :  { %p1334_p1 = scmp.ne.s32.totalorder %s58_s1, %s1333_s0  ;;  %p1339_p3 = scmp.lt.s32.totalorder %s1333_s0, %s1333_s0 }
  0x29   :  { %p1340_p4 = por %p1339_p3, %p1338_p2 }
  0x2b   :  { %p1341_p5 = pnand %p1340_p4, %p1334_p1 }
  0x2d   :  { %1344 = shalt.err (!%p1341_p5)
}
  0x2e   :  { %63 = dma.hbm_to_vmem [thread:$0]  %s1475_s4, 1024, %s58_s1, [#allocation9], %s1374_s21, %s1374_s21, %s1375_s22  }
  0x2f   :  { %1365 = dma.done.wait [#allocation3], 1792  }
  0x30   :  { %1366 = vsyncadd [#allocation3], 4294965504 }
  0x31   :  { %1367 = dma.done.wait [#allocation6], 7296  }
  0x32   :  { %1368 = vsyncadd [#allocation6], 4294960000 }
  0x33   :  { %1369 = dma.done.wait [#allocation9], 1024  }
  0x34   :  { %1370 = vsyncadd [#allocation9], 4294966272  ;;  %v1184_v0 = vld [vmem:[#allocation5 + $0x78] sm:$0xff]   ;;  %v1188_v4 = vld [vmem:[#allocation5 + $0x70] sm:$0xff]   ;;  %v1381_v43 = vmov 0.0   ;;  %vm1382_vm0 = vmmov 0  }
  0x35   :  { %v1185_v1 = vld [vmem:[#allocation5 + $0x38] sm:$0xff]   ;;  %1041 = vmatprep.subr.bf16.mxu0 %v1184_v0  ;;  %v1189_v5 = vld [vmem:[#allocation5 + $0x30] sm:$0xff]   ;;  %v1192_v8 = vld [vmem:[#allocation5 + $0x68] sm:$0xff]   ;;  %vm497_vm1 = vcmask 130048  }
  0x36   :  { %v1186_v2 = vld [vmem:[#allocation5 + $0xf8] sm:$0xff]   ;;  %1042 = vmatpush3.bf16.msra.mxu0 %v1185_v1  ;;  %v1190_v6 = vld [vmem:[#allocation5 + $0xf0] sm:$0xff]   ;;  %v1193_v9 = vld [vmem:[#allocation5 + $0x28] sm:$0xff]  }
  0x37   :  { %v1187_v3 = vld [vmem:[#allocation5 + $0xb8] sm:$0xff]   ;;  %1063 = vmatprep.subr.bf16.mxu1 %v1186_v2  ;;  %1043 = vmatprep.subr.bf16.mxu0 %v1188_v4  ;;  %v1191_v7 = vld [vmem:[#allocation5 + $0xb0] sm:$0xff]   ;;  %v1194_v10 = vld [vmem:[#allocation5 + $0xe8] sm:$0xff]  }
  0x38   :  { %1064 = vmatpush3.bf16.msra.mxu1 %v1187_v3  ;;  %v1195_v11 = vld [vmem:[#allocation5 + $0xa8] sm:$0xff]   ;;  %v1196_v12 = vld [vmem:[#allocation5 + $0x60] sm:$0xff]   ;;  %v1200_v16 = vld [vmem:[#allocation5 + $0x58] sm:$0xff]  }
  0x39   :  { %1065 = vmatprep.subr.bf16.mxu1 %v1190_v6  ;;  %v1197_v13 = vld [vmem:[#allocation5 + $0x20] sm:$0xff]   ;;  %v1201_v17 = vld [vmem:[#allocation5 + $0x18] sm:$0xff]   ;;  %v1204_v20 = vld [vmem:[#allocation5 + $0x50] sm:$0xff]  }
  0x3a   :  { %1044 = vmatpush3.bf16.msra.mxu0 %v1189_v5  ;;  %v1198_v14 = vld [vmem:[#allocation5 + $0xe0] sm:$0xff]   ;;  %v1202_v18 = vld [vmem:[#allocation5 + $0xd8] sm:$0xff]   ;;  %v1205_v21 = vld [vmem:[#allocation5 + $0x10] sm:$0xff]  }
  0x3b   :  { %1045 = vmatprep.subr.bf16.mxu0 %v1192_v8  ;;  %v1199_v15 = vld [vmem:[#allocation5 + $0xa0] sm:$0xff]   ;;  %v1203_v19 = vld [vmem:[#allocation5 + $0x98] sm:$0xff]   ;;  %v1206_v22 = vld [vmem:[#allocation5 + $0xd0] sm:$0xff]  }
  0x3c   :  { %1066 = vmatpush3.bf16.msra.mxu1 %v1191_v7  ;;  %v1207_v23 = vld [vmem:[#allocation5 + $0x90] sm:$0xff]   ;;  %v1208_v24 = vld [vmem:[#allocation5 + $0x48] sm:$0xff]   ;;  %v1212_v28 = vld [vmem:[#allocation5 + $0x40] sm:$0xff]  }
  0x3d   :  { %1067 = vmatprep.subr.bf16.mxu1 %v1194_v10  ;;  %v1209_v25 = vld [vmem:[#allocation5 + $0x8] sm:$0xff]   ;;  %v1213_v29 = vld [vmem:[#allocation5] sm:$0xff]   ;;  %v78_v31 = vld [vmem:[#allocation2 + $0x8] sm:$0xff] }
  0x3e   :  { %1046 = vmatpush3.bf16.msra.mxu0 %v1193_v9  ;;  %v1210_v26 = vld [vmem:[#allocation5 + $0xc8] sm:$0xff]   ;;  %v1214_v30 = vld [vmem:[#allocation5 + $0xc0] sm:$0xff]   ;;  %v85_v32 = vld [vmem:[#allocation2 + $0x40] sm:$0xff] }
  0x3f   :  { %1047 = vmatprep.subr.bf16.mxu0 %v1196_v12  ;;  %v1211_v27 = vld [vmem:[#allocation5 + $0x88] sm:$0xff]   ;;  %v92_v33 = vpack.c.bf16 %v85_v32, %v78_v31  ;;  %v1215_v34 = vld [vmem:[#allocation5 + $0x80] sm:$0xff]   ;;  %v77_v35 = vld [vmem:[#allocation2] sm:$0xff] }
  0x40   :  { %1068 = vmatpush3.bf16.msra.mxu1 %v1195_v11  ;;  %v84_v36 = vld [vmem:[#allocation2 + $0x38] sm:$0xff]  ;;  %v1216_v38 = vld [vmem:[#allocation5 + $0x178] sm:$0xff]   ;;  %v87_v40 = vld [vmem:[#allocation2 + $0x50] sm:$0xff] }
  0x41   :  { %1069 = vmatprep.subr.bf16.mxu1 %v1198_v14  ;;  %533 = vmatprep.mubr.bf16.mxu0 %v92_v33  ;;  %v91_v37 = vpack.c.bf16 %v84_v36, %v77_v35  ;;  %v80_v39 = vld [vmem:[#allocation2 + $0x18] sm:$0xff]  ;;  %v1217_v42 = vld [vmem:[#allocation5 + $0x138] sm:$0xff]   ;;  %v79_v44 = vld [vmem:[#allocation2 + $0x10] sm:$0xff] }
  0x42   :  { %1048 = vmatpush3.bf16.msra.mxu0 %v1197_v13  ;;  %v94_v41 = vpack.c.bf16 %v87_v40, %v80_v39  ;;  %v86_v45 = vld [vmem:[#allocation2 + $0x48] sm:$0xff]  ;;  %v1218_v47 = vld [vmem:[#allocation5 + $0x170] sm:$0xff]   ;;  %v1220_v49 = vld [vmem:[#allocation5 + $0x168] sm:$0xff]  }
  0x43   :  { %1049 = vmatprep.subr.bf16.mxu0 %v1200_v16  ;;  %v93_v46 = vpack.c.bf16 %v86_v45, %v79_v44  ;;  %v1219_v48 = vld [vmem:[#allocation5 + $0x130] sm:$0xff]   ;;  %v1221_v50 = vld [vmem:[#allocation5 + $0x128] sm:$0xff]   ;;  %v1222_v51 = vld [vmem:[#allocation5 + $0x160] sm:$0xff]  }
  0x44   :  { %1070 = vmatpush3.bf16.msra.mxu1 %v1199_v15  ;;  %574 = vmatprep.mubr.bf16.mxu1 %v94_v41  ;;  %v1223_v52 = vld [vmem:[#allocation5 + $0x120] sm:$0xff]   ;;  %v1224_v53 = vld [vmem:[#allocation5 + $0x158] sm:$0xff]   ;;  %v1226_v55 = vld [vmem:[#allocation5 + $0x150] sm:$0xff]  }
  0x45   :  { %1071 = vmatprep.subr.bf16.mxu1 %v1202_v18  ;;  %v1225_v54 = vld [vmem:[#allocation5 + $0x118] sm:$0xff]   ;;  %v1232_v56 = vld [vmem:[#allocation5 + $0x180] sm:$0xff]   ;;  %v1227_v58 = vld [vmem:[#allocation5 + $0x110] sm:$0xff]  }
  0x46   :  { %1050 = vmatpush3.bf16.msra.mxu0 %v1201_v17  ;;  %v82_v57 = vld [vmem:[#allocation2 + $0x28] sm:$0xff]  ;;  %v1228_v59 = vld [vmem:[#allocation5 + $0x148] sm:$0xff]   ;;  %v89_v60 = vld [vmem:[#allocation2 + $0x60] sm:$0xff] }
  0x47   :  { %1051 = vmatprep.subr.bf16.mxu0 %v1204_v20  ;;  %v96_v61 = vpack.c.bf16 %v89_v60, %v82_v57  ;;  %v83_v62 = vld [vmem:[#allocation2 + $0x30] sm:$0xff]  ;;  %v90_v63 = vld [vmem:[#allocation2 + $0x68] sm:$0xff]  ;;  %v1229_v1 = vld [vmem:[#allocation5 + $0x108] sm:$0xff]  }
  0x48   :  { %1072 = vmatpush3.bf16.msra.mxu1 %v1203_v19  ;;  %v97_v0 = vpack.c.bf16 %v90_v63, %v83_v62  ;;  %v1230_v2 = vld [vmem:[#allocation5 + $0x140] sm:$0xff]   ;;  %v81_v4 = vld [vmem:[#allocation2 + $0x20] sm:$0xff]  ;;  %v88_v5 = vld [vmem:[#allocation2 + $0x58] sm:$0xff] }
  0x49   :  { %1073 = vmatprep.subr.bf16.mxu1 %v1206_v22  ;;  %v1231_v3 = vld [vmem:[#allocation5 + $0x100] sm:$0xff]   ;;  %v95_v6 = vpack.c.bf16 %v88_v5, %v81_v4  ;;  %v1234_v8 = vld [vmem:[#allocation7 + $0x30] sm:$0xff]   ;;  %v1235_v9 = vld [vmem:[#allocation7 + $0x28] sm:$0xff]  }
  0x4a   :  { %1052 = vmatpush3.bf16.msra.mxu0 %v1205_v21  ;;  %v1233_v7 = vld [vmem:[#allocation7 + $0x38] sm:$0xff]   ;;  %v1236_v10 = vld [vmem:[#allocation7 + $0x20] sm:$0xff]   ;;  %v1238_v12 = vld [vmem:[#allocation7 + $0x10] sm:$0xff]  }
  0x4b   :  { %1053 = vmatprep.subr.bf16.mxu0 %v1208_v24  ;;  %v1237_v11 = vld [vmem:[#allocation7 + $0x18] sm:$0xff]   ;;  %v1239_v13 = vld [vmem:[#allocation7 + $0x8] sm:$0xff]   ;;  %v1240_v14 = vld [vmem:[#allocation7] sm:$0xff]  }
  0x4c   :  { %1074 = vmatpush3.bf16.msra.mxu1 %v1207_v23  ;;  %v1241_v15 = vld [vmem:[#allocation8 + $0x38] sm:$0xff]   ;;  %v1243_v62 = vld [vmem:[#allocation8 + $0x28] sm:$0xff]   ;;  %v1244_v63 = vld [vmem:[#allocation8 + $0x20] sm:$0xff]  }
  0x4d   :  { %1075 = vmatprep.subr.bf16.mxu1 %v1210_v26 }
  0x4e   :  { %1054 = vmatpush3.bf16.msra.mxu0 %v1209_v25 }
  0x4f   :  { %1055 = vmatprep.subr.bf16.mxu0 %v1212_v28  ;;  %v961_v28 = vld [vmem:[%s1473_s2] ss:$0 sm:$0xff]  ;;  %s1383_s2 = smov [#allocation10]  }
  0x50   :  { %1076 = vmatpush3.bf16.msra.mxu1 %v1211_v27  ;;  %s947_s15 = sshll.u32 %s1383_s2, 4  ;;  %s948_s15 = int_to_ptr.vmem [resolvable:$true] %s947_s15 }
  0x51   :  { %1077 = vmatprep.subr.bf16.mxu1 %v1214_v30  ;;  %s1345_s16 = scalar_lea.vmem %s948_s15, 128  ;;  %p1350_p7 = scmp.lt.s32.totalorder %s948_s15, %s948_s15 }
  0x52   :  { %1056 = vmatpush3.bf16.msra.mxu0 %v1213_v29  ;;  %p1346_p6 = scmp.ne.s32.totalorder %s948_s15, %s1345_s16  ;;  %p1351_p8 = scmp.lt.s32.totalorder %s1345_s16, %s1345_s16 }
  0x53   :  { %1085 = vmatprep.subr.bf16.mxu0 %v1216_v38 }
  0x54   :  { %1078 = vmatpush3.bf16.msra.mxu1 %v1215_v34  ;;  %p1352_p9 = por %p1351_p8, %p1350_p7 }
  0x55   :  { %1127 = vmatprep.subr.bf16.mxu1 %v1381_v43  ;;  %534 = vmatmul.mubr.bf16.vlgmr.msra.gmra.mxu0 %v91_v37 }
  0x56   :  { %1086 = vmatpush3.bf16.msra.mxu0 %v1217_v42  ;;  %615 = vmatprep.mubr.bf16.mxu0 %v96_v61  ;;  %v1242_v61 = vld [vmem:[#allocation8 + $0x30] sm:$0xff]   ;;  %p1353_p10 = pnand %p1352_p9, %p1346_p6 }
  0x57   :  { %575 = vmatmul.mubr.bf16.vlgmr.msra.gmra.mxu1 %v93_v46  ;;  %1087 = vmatprep.subr.bf16.mxu0 %v1218_v47 }
  0x58   :  { %1129 = vmatprep.mubr.msk.bf16.mxu1 %vm1382_vm0, %v1381_v43  ;;  %1128 = vmatpush3.bf16.msra.mxu1 %v1232_v56 }
  0x59   :  { %1133 = vmatprep.subr.bf16.mxu1 %v1381_v43 }
  0x5a   :  { %1088 = vmatpush3.bf16.msra.mxu0 %v1219_v48 }
  0x5b   :  { %1089 = vmatprep.subr.bf16.mxu0 %v1220_v49 }
  0x5e   :  { %1090 = vmatpush3.bf16.msra.mxu0 %v1221_v50 }
  0x5f   :  { %1091 = vmatprep.subr.bf16.mxu0 %v1222_v51  ;;  %1130 = vmatmul.mubr.msk.bf16.vlgmr.msra.gmra.mxu1 %vm497_vm1, %v97_v0  ;;  %v1245_v0 = vld [vmem:[#allocation8 + $0x18] sm:$0xff]  }
  0x60   :  { %1149 = vmatprep.mubr.msk.bf16.mxu1 %vm1382_vm0, %v1381_v43  ;;  %1134 = vmatpush3.bf16.msra.mxu1 %v1233_v7 }
  0x61   :  { %1135 = vmatprep.subr.bf16.mxu1 %v1381_v43 }
  0x62   :  { %1092 = vmatpush3.bf16.msra.mxu0 %v1223_v52 }
  0x63   :  { %1093 = vmatprep.subr.bf16.mxu0 %v1224_v53 }
  0x64   :  { %1136 = vmatpush3.bf16.msra.mxu1 %v1234_v8 }
  0x65   :  { %1137 = vmatprep.subr.bf16.mxu1 %v1381_v43 }
  0x66   :  { %1094 = vmatpush3.bf16.msra.mxu0 %v1225_v54 }
  0x67   :  { %1095 = vmatprep.subr.bf16.mxu0 %v1226_v55 }
  0x68   :  { %1138 = vmatpush3.bf16.msra.mxu1 %v1235_v9 }
  0x69   :  { %1139 = vmatprep.subr.bf16.mxu1 %v1381_v43 }
  0x6a   :  { %1096 = vmatpush3.bf16.msra.mxu0 %v1227_v58 }
  0x6b   :  { %1097 = vmatprep.subr.bf16.mxu0 %v1228_v59 }
  0x6c   :  { %1140 = vmatpush3.bf16.msra.mxu1 %v1236_v10 }
  0x6d   :  { %1141 = vmatprep.subr.bf16.mxu1 %v1381_v43 }
  0x6e   :  { %1098 = vmatpush3.bf16.msra.mxu0 %v1229_v1  ;;  %v1246_v1 = vld [vmem:[#allocation8 + $0x10] sm:$0xff]  }
  0x6f   :  { %1099 = vmatprep.subr.bf16.mxu0 %v1230_v2  ;;  %v1247_v2 = vld [vmem:[#allocation8 + $0x8] sm:$0xff]  }
  0x70   :  { %1142 = vmatpush3.bf16.msra.mxu1 %v1237_v11 }
  0x71   :  { %1143 = vmatprep.subr.bf16.mxu1 %v1381_v43 }
  0x72   :  { %1100 = vmatpush3.bf16.msra.mxu0 %v1231_v3  ;;  %v1248_v3 = vld [vmem:[#allocation8] sm:$0xff]  }
  0x73   :  { %1153 = vmatprep.subr.bf16.mxu0 %v1381_v43 }
  0x74   :  { %1144 = vmatpush3.bf16.msra.mxu1 %v1238_v12 }
  0x75   :  { %616 = vmatmul.mubr.bf16.vlgmr.msra.gmra.mxu0 %v95_v6  ;;  %1145 = vmatprep.subr.bf16.mxu1 %v1381_v43 }
  0x76   :  { %1169 = vmatprep.mubr.msk.bf16.mxu0 %vm1382_vm0, %v1381_v43  ;;  %1154 = vmatpush3.bf16.msra.mxu0 %v1241_v15 }
  0x77   :  { %1155 = vmatprep.subr.bf16.mxu0 %v1381_v43 }
  0x78   :  { %1146 = vmatpush3.bf16.msra.mxu1 %v1239_v13 }
  0x79   :  { %1147 = vmatprep.subr.bf16.mxu1 %v1381_v43 }
  0x7a   :  { %1156 = vmatpush3.bf16.msra.mxu0 %v1242_v61 }
  0x7b   :  { %1157 = vmatprep.subr.bf16.mxu0 %v1381_v43 }
  0x7c   :  { %1148 = vmatpush3.bf16.msra.mxu1 %v1240_v14 }
  0x7e   :  { %1158 = vmatpush3.bf16.msra.mxu0 %v1243_v62 }
  0x7f   :  { %1159 = vmatprep.subr.bf16.mxu0 %v1381_v43 }
  0x82   :  { %1160 = vmatpush3.bf16.msra.mxu0 %v1244_v63 }
  0x83   :  { %1161 = vmatprep.subr.bf16.mxu0 %v1381_v43 }
  0x86   :  { %1162 = vmatpush3.bf16.msra.mxu0 %v1245_v0 }
  0x87   :  { %1163 = vmatprep.subr.bf16.mxu0 %v1381_v43 }
  0x8a   :  { %1164 = vmatpush3.bf16.msra.mxu0 %v1246_v1 }
  0x8b   :  { %1165 = vmatprep.subr.bf16.mxu0 %v1381_v43 }
  0x8e   :  { %1166 = vmatpush3.bf16.msra.mxu0 %v1247_v2 }
  0x8f   :  { %1167 = vmatprep.subr.bf16.mxu0 %v1381_v43 }
  0x92   :  { %1168 = vmatpush3.bf16.msra.mxu0 %v1248_v3 }
 0x115   :  { %v1057_v19 = vpop.f32.mrf.mxu0 }
 0x117   :  { %v1079_v16 = vpop.f32.mrf.mxu1  ;;  %v1058_v21 = vpop.f32.mrf.mxu0 }
 0x118   :  { %v1059_v27 = vadd.f32 %v1058_v21, %v1057_v19 }
 0x119   :  { %v1080_v17 = vpop.f32.mrf.mxu1  ;;  %v1060_v24 = vpop.f32.mrf.mxu0 }
 0x11a   :  { %v536_v30 = vadd.f32 %v1059_v27, %v961_v28  ;;  %v1081_v31 = vadd.f32 %v1080_v17, %v1079_v16 }
 0x11b   :  { %v1082_v18 = vpop.f32.mrf.mxu1  ;;  %v1061_v29 = vpop.f32.mrf.mxu0 }
 0x11c   :  { %v1062_v32 = vadd.f32 %v1061_v29, %v1060_v24  ;;  %v577_v35 = vadd.f32 %v1081_v31, %v536_v30 }
 0x11d   :  { %v1083_v20 = vpop.f32.mrf.mxu1 }
 0x11e   :  { %v539_v36 = vadd.f32 %v1062_v32, %v961_v28  ;;  %v1084_v37 = vadd.f32 %v1083_v20, %v1082_v18  ;;  %v905_v20 = vlaneseq }
 0x11f   :  { %v658_v22 = vpop.f32.mrf.mxu1 }
 0x120   :  { %v580_v42 = vadd.f32 %v1084_v37, %v539_v36  ;;  %v906_v21 = vand.u32 127, %v905_v20 }
 0x121   :  { %v1131_v23 = vpop.f32.mrf.mxu1 }
 0x122   :  { %vm907_vm6 = vcmp.lt.s32.totalorder %v906_v21, 10 }
 0x123   :  { %v661_v25 = vpop.f32.mrf.mxu1 }
 0x125   :  { %v1132_v26 = vpop.f32.mrf.mxu1 }
 0x135   :  { %v1101_v33 = vpop.f32.mrf.mxu0 }
 0x137   :  { %v1102_v34 = vpop.f32.mrf.mxu0 }
 0x138   :  { %v1103_v38 = vadd.f32 %v1102_v34, %v1101_v33 }
 0x139   :  { %v1104_v39 = vpop.f32.mrf.mxu0 }
 0x13a   :  { %v618_v40 = vadd.f32 %v1103_v38, %v577_v35 }
 0x13b   :  { %v1105_v41 = vpop.f32.mrf.mxu0 }
 0x13c   :  { %v659_v44 = vadd.f32 %v658_v22, %v618_v40  ;;  %v1106_v45 = vadd.f32 %v1105_v41, %v1104_v39 }
 0x13e   :  { %v667_v46 = vmul.f32 1.442695, %v659_v44  ;;  %v621_v47 = vadd.f32 %v1106_v45, %v580_v42  ;;  %vm665_vm2 = vcmp.gt.f32.partialorder %v659_v44, 0.0 }
 0x140   :  { %1249 = vpow2.f32 %v667_v46  ;;  %v662_v48 = vadd.f32 %v661_v25, %v621_v47 }
 0x142   :  { %v669_v49 = vmul.f32 1.442695, %v662_v48  ;;  %vm666_vm3 = vcmp.gt.f32.partialorder %v662_v48, 0.0 }
 0x144   :  { %1251 = vpow2.f32 %v669_v49 }
 0x14d   :  { %v1250_v50 = vpop.eup %1249 }
 0x14e   :  { %v1012_v51 = vadd.f32 -1.0, %v1250_v50 }
 0x150   :  { %v673_v52 = vmul.f32 1.6732632, %v1012_v51 }
 0x151   :  { %v1252_v53 = vpop.eup %1251 }
 0x152   :  { %v1013_v54 = vadd.f32 -1.0, %v1252_v53  ;;  %v675_v55 = vsel %vm665_vm2, %v659_v44, %v673_v52 }
 0x153   :  { %v677_v58 = vmul.f32 1.050701, %v675_v55 }
 0x154   :  { %v674_v56 = vmul.f32 1.6732632, %v1013_v54 }
 0x156   :  { %v676_v57 = vsel %vm666_vm3, %v662_v48, %v674_v56 }
 0x157   :  { %v678_v59 = vmul.f32 1.050701, %v676_v57 }
 0x159   :  { %v679_v60 = vpack.c.bf16 %v678_v59, %v677_v58 }
 0x15b   :  { %1150 = vmatmul.mubr.bf16.vlgmr.msra.gmra.mxu1 %v679_v60 }
 0x21b   :  { %v778_v4 = vpop.f32.mrf.mxu1 }
 0x21c   :  { %v787_v5 = vmul.f32 1.442695, %v778_v4  ;;  %vm785_vm4 = vcmp.gt.f32.partialorder %v778_v4, 0.0 }
 0x21d   :  { %v1151_v6 = vpop.f32.mrf.mxu1 }
 0x21e   :  { %1253 = vpow2.f32 %v787_v5 }
 0x21f   :  { %v781_v7 = vpop.f32.mrf.mxu1 }
 0x220   :  { %v789_v8 = vmul.f32 1.442695, %v781_v7  ;;  %vm786_vm5 = vcmp.gt.f32.partialorder %v781_v7, 0.0 }
 0x221   :  { %v1152_v9 = vpop.f32.mrf.mxu1 }
 0x222   :  { %1255 = vpow2.f32 %v789_v8 }
 0x22b   :  { %v1254_v10 = vpop.eup %1253 }
 0x22c   :  { %v1022_v11 = vadd.f32 -1.0, %v1254_v10 }
 0x22e   :  { %v793_v12 = vmul.f32 1.6732632, %v1022_v11 }
 0x22f   :  { %v1256_v13 = vpop.eup %1255 }
 0x230   :  { %v1023_v14 = vadd.f32 -1.0, %v1256_v13  ;;  %v795_v15 = vsel %vm785_vm4, %v778_v4, %v793_v12 }
 0x231   :  { %v797_v17 = vmul.f32 1.050701, %v795_v15 }
 0x232   :  { %v794_v16 = vmul.f32 1.6732632, %v1023_v14 }
 0x234   :  { %v796_v43 = vsel %vm786_vm5, %v781_v7, %v794_v16 }
 0x235   :  { %v798_v18 = vmul.f32 1.050701, %v796_v43 }
 0x237   :  { %v799_v19 = vpack.c.bf16 %v798_v18, %v797_v17 }
 0x239   :  { %1170 = vmatmul.mubr.bf16.vlgmr.msra.gmra.mxu0 %v799_v19 }
 0x2f9   :  { %v898_v22 = vpop.f32.mrf.mxu0 }
 0x2fa   :  { %v908_v23 = vsel %vm907_vm6, %v898_v22, -1e+30 }
 0x2fb   :  { %910 = vmax.xlane.f32.xlu0 %v908_v23  ;;  %v1171_v24 = vpop.f32.mrf.mxu0 }
 0x2fd   :  { %v901_v25 = vpop.f32.mrf.mxu0 }
 0x2fe   :  { %v909_v26 = vsel %vm907_vm6, %v901_v25, -1e+30 }
 0x2ff   :  { %912 = vmax.xlane.f32.xlu0 %v909_v26  ;;  %v1172_v27 = vpop.f32.mrf.mxu0 }
 0x384   :  { %v911_v28 = vpop.xlane.xlu0 %910 }
 0x385   :  { %v914_v29 = vsub.f32 %v908_v23, %v911_v28 }
 0x387   :  { %v916_v30 = vmul.f32 1.442695, %v914_v29 }
 0x388   :  { %v913_v31 = vpop.xlane.xlu0 %912 }
 0x389   :  { %v915_v32 = vsub.f32 %v909_v26, %v913_v31  ;;  %1257 = vpow2.f32 %v916_v30 }
 0x38b   :  { %v918_v33 = vmul.f32 1.442695, %v915_v32 }
 0x38d   :  { %1259 = vpow2.f32 %v918_v33 }
 0x396   :  { %v1258_v34 = vpop.eup %1257 }
 0x397   :  { %920 = vadd.xlane.f32.xlu1 %v1258_v34 }
 0x39a   :  { %v1260_v35 = vpop.eup %1259 }
 0x39b   :  { %922 = vadd.xlane.f32.xlu1 %v1260_v35 }
 0x420   :  { %v921_v36 = vpop.xlane.xlu1 %920 }
 0x421   :  { %1261 = vlog2.f32 %v921_v36 }
 0x424   :  { %v923_v37 = vpop.xlane.xlu1 %922 }
 0x425   :  { %1263 = vlog2.f32 %v923_v37 }
 0x42e   :  { %v1262_v38 = vpop.eup %1261 }
 0x42f   :  { %v925_v39 = vmul.f32 0.6931472, %v1262_v38 }
 0x431   :  { %v928_v41 = vsub.f32 %v914_v29, %v925_v39 }
 0x432   :  { %v1264_v40 = vpop.eup %1263 }
 0x433   :  { %v927_v42 = vmul.f32 0.6931472, %v1264_v40  ;;  %v930_v45 = vsel %vm907_vm6, %v928_v41, 0.0 }
 0x435   :  { %v929_v44 = vsub.f32 %v915_v32, %v927_v42 }
 0x437   :  { %v931_v46 = vsel %vm907_vm6, %v929_v44, 0.0 }
 0x438   :  { %v1039_v47 = vpack.c.bf16 %v931_v46, %v930_v45 }
 0x43a   :  { %1040 = vst [vmem:[#allocation10] sm:$0xff] %v1039_v47  }
 0x43b   :  { %1356 = shalt.err (!%p1353_p10)
}
 0x43c   :  { %953 = dma.vmem_to_hbm [thread:$0]  %s948_s15, 128, %s1476_s5, [#allocation4], %s1374_s21, %s1374_s21, %s1375_s22  }
 0x43d   :  { %1371 = dma.done.wait [#allocation4], 128  }
 0x43e   :  { %1372 = vsyncadd [#allocation4], 4294967168 }
 0x43f   :  { %957 = vsyncpa [#allocation3], 1 }
 0x440   :  { %958 = vsyncpa [#allocation6], 1 }
 0x441   :  { %959 = vsyncpa [#allocation9], 1 }
 0x442   :  { %960 = vsyncpa [#allocation4], 1 }

</bundles_post_ra>
